<compile_context>
chip_gen: v7x
topology: tpu7x:2x2x1
jax: 0.10.0
libtpu: 0.0.40
codegen_flags: <defaults>
</compile_context>

<pallas_src>
import jax
import jax.numpy as jnp
from jax.experimental import pallas as pl
from jax.experimental.pallas import tpu as pltpu


def _head_kernel(x12_ref,            # [TB, 2H]   activations (f32 or bf16)
                 wa_ref,             # [H, 3*Hp+128] = [W1 | W2 | dense_x1 | Vx1] (MXU dtype)
                 b1_ref, b2_ref,     # [1, H] f32   (V_nn x2-columns already folded in)
                 vb_ref,             # [1, 128] f32 (V_nn bias, lane-padded)
                 wb_ref,             # [H, H]  dense_x2                          (MXU dtype)
                 dnt_ref,            # [2, H]  f32  dense rows for ntn1/ntn2
                 db_ref,             # [1, H]  f32  dense bias
                 ow_ref,             # [H, Lpad] out_proj (lane-padded)          (MXU dtype)
                 ob_ref,             # [1, Lpad] f32
                 logits_ref, y_ref):
    x12 = x12_ref[...]                                 # [TB, 2H]
    H = x12.shape[-1] // 2
    Hp = (wa_ref.shape[-1] - 128) // 3                 # 128-aligned segment width
    cd = wa_ref.dtype                                  # MXU compute dtype

    # Pair split inside the kernel.  VPU/epilogue path uses f32; MXU operands
    # are cast to the compute dtype only for the matmuls.
    x1f = x12[:, 0:H].astype(jnp.float32)
    x2f = x12[:, H:2 * H].astype(jnp.float32)
    x1m = x12[:, 0:H].astype(cd)
    x2m = x12[:, H:2 * H].astype(cd)

    # --- fused NTN(W1,W2) + dense(x1) + V_nn(x1 columns): ONE MXU pass -------
    r1 = jnp.dot(x1m, wa_ref[...], preferred_element_type=jnp.float32)  # [TB, 3Hp+128]

    o1 = r1[:, 0:H] + b1_ref[...]               # b1' = b1 + vw[H:2H, 0]^T
    o2 = r1[:, Hp:Hp + H] + b2_ref[...]         # b2' = b2 + vw[H:2H, 1]^T
    dx1 = r1[:, 2 * Hp:2 * Hp + H]              # dense(x1) contribution

    s1 = jnp.sum(o1 * x2f, axis=1, keepdims=True)        # [TB, 1]
    s2 = jnp.sum(o2 * x2f, axis=1, keepdims=True)        # [TB, 1]

    vb = vb_ref[...]
    ntn1 = jnp.maximum(s1 + r1[:, 3 * Hp:3 * Hp + 1] + vb[0:1, 0:1], 0.0)
    ntn2 = jnp.maximum(s2 + r1[:, 3 * Hp + 1:3 * Hp + 2] + vb[0:1, 1:2], 0.0)

    # --- dense( cat(x1, x2, ntn1, ntn2) ) ------------------------------------
    dx2 = jnp.dot(x2m, wb_ref[...], preferred_element_type=jnp.float32)  # [TB, H]
    d = (dx1 + dx2
         + ntn1 * dnt_ref[0:1, :]
         + ntn2 * dnt_ref[1:2, :]
         + db_ref[...])
    h = jnp.tanh(d)                                       # [TB, H] f32
    y_ref[...] = h.astype(y_ref.dtype)

    # --- out_proj into a lane-dense (128-wide) padded tile -------------------
    logits = (jnp.dot(h.astype(ow_ref.dtype), ow_ref[...],
                      preferred_element_type=jnp.float32) + ob_ref[...])  # [TB, Lpad]
    logits_ref[...] = logits.astype(logits_ref.dtype)


def prepare_params(params, num_labels, compute_dtype=jnp.bfloat16):
    """One-time repack of PyTorch-style weights into the fused kernel layout.

    Weights in `params` are stored as [in_features, out_features]
    (i.e. torch Linear.weight transposed).  compute_dtype is the MXU operand
    dtype (bf16 is the production default; f32 only for exactness tests).
    """
    H = params["w1"].shape[0]
    L = num_labels
    Hp = ((H + 127) // 128) * 128                 # lane-aligned segment width
    Lpad = max(128, ((L + 127) // 128) * 128)
    cd = jnp.dtype(compute_dtype)

    dw = params["dw"].astype(jnp.float32)          # [2H+2, H]
    vw = params["vw"].astype(jnp.float32)          # [2H, 2]

    # wa = [W1 | W2 | dense_x1 | Vnn_x1-cols], each segment 128-lane aligned.
    wa = jnp.zeros((H, 3 * Hp + 128), jnp.float32)
    wa = wa.at[:, 0:H].set(params["w1"].astype(jnp.float32))
    wa = wa.at[:, Hp:Hp + H].set(params["w2"].astype(jnp.float32))
    wa = wa.at[:, 2 * Hp:2 * Hp + H].set(dw[:H, :])
    wa = wa.at[:, 3 * Hp:3 * Hp + 2].set(vw[:H, :])

    # Fold the x2-half of V_nn into the NTN biases:
    #   sum((x1@W1 + b1 + vw[H:,0]^T) * x2) = s1 + x2 @ vw[H:,0]
    b1 = params["b1"].astype(jnp.float32) + vw[H:2 * H, 0][None, :]
    b2 = params["b2"].astype(jnp.float32) + vw[H:2 * H, 1][None, :]

    wb = dw[H:2 * H, :]                            # dense(x2) weights
    dnt = dw[2 * H:2 * H + 2, :]                   # dense rows for ntn1/ntn2

    vb_pad = jnp.zeros((1, 128), jnp.float32).at[0, :2].set(
        params["vb"].astype(jnp.float32).reshape(2))

    ow_pad = jnp.zeros((H, Lpad), jnp.float32).at[:, :L].set(
        params["ow"].astype(jnp.float32))
    ob_pad = jnp.zeros((1, Lpad), jnp.float32).at[:, :L].set(
        params["ob"].astype(jnp.float32))

    return {
        # MXU-facing (compute dtype, e.g. bf16)
        "wa": wa.astype(cd),
        "wb": wb.astype(cd),
        "ow": ow_pad.astype(cd),
        # VPU-facing / biases stay f32
        "b1": b1, "b2": b2,
        "vb": vb_pad,
        "dnt": dnt,
        "db": params["db"].astype(jnp.float32),
        "ob": ob_pad,
        # metadata
        "num_labels": L, "lpad": Lpad, "hidden": H, "hpad": Hp,
        "compute_dtype": cd,
    }


def roberta_classification_head(features, packed, *, block_b=256,
                                out_dtype=jnp.float32):
    """features: [B, S, H]. Returns (logits [B//2, num_labels], y [B//2, H])."""
    B, S, H = features.shape
    assert B % 2 == 0, "batch must be even: CLS tokens are paired"
    assert H == packed["hidden"]
    b = B // 2
    L, Lpad, Hp = packed["num_labels"], packed["lpad"], packed["hpad"]

    # CLS token of each sequence; consecutive sequences are a pair.  Single
    # slice + free reshape; split/cast happen inside the kernel.
    x12 = features[:, 0, :].reshape(b, 2 * H)
    in_isz = x12.dtype.itemsize

    # Batch tile: 256 rows feed the 256-wide MXU on v6e/v7x.
    tb = min(block_b, b)
    num_tiles = pl.cdiv(b, tb)
    grid = (num_tiles,)

    x_spec = pl.BlockSpec((tb, 2 * H), lambda i: (i, 0))

    weights = [packed["wa"], packed["b1"], packed["b2"], packed["vb"],
               packed["wb"], packed["dnt"], packed["db"],
               packed["ow"], packed["ob"]]
    # Constant block index -> DMA'd once, resident across batch tiles.
    # Buffered(1): no second pipeline buffer for them (halves weight VMEM).
    weight_specs = [pl.BlockSpec(w.shape, lambda i: (0, 0),
                                 pipeline_mode=pl.Buffered(1)) for w in weights]

    out_shape = (jax.ShapeDtypeStruct((b, Lpad), out_dtype),
                 jax.ShapeDtypeStruct((b, H), out_dtype))
    out_specs = (pl.BlockSpec((tb, Lpad), lambda i: (i, 0)),
                 pl.BlockSpec((tb, H), lambda i: (i, 0)))

    # Megacore split only pays when each core gets >= 2 full tiles; otherwise
    # stay on one core so the resident weight set is fetched only once.
    dim_sem = ("parallel",) if num_tiles >= 4 else ("arbitrary",)

    out_isz = jnp.dtype(out_dtype).itemsize
    weight_bytes = sum(int(w.size) * w.dtype.itemsize for w in weights)
    flops = int(2 * b * H * ((3 * Hp + 128) + H + Lpad) + 12 * b * H)
    bytes_accessed = int(weight_bytes + b * 2 * H * in_isz
                         + b * (H + Lpad) * out_isz)
    cost = pl.CostEstimate(flops=flops, transcendentals=int(b * H),
                           bytes_accessed=bytes_accessed)

    # VMEM need: single-buffered weights + double-buffered activation/output
    # tiles + f32 intermediates + 2 MiB headroom.  Floor only at the smallest
    # platform default (16 MiB); no artificial 32 MiB floor / 48 MiB cap.
    act_bytes = 2 * tb * 2 * H * in_isz
    out_bytes = 2 * tb * (H + Lpad) * out_isz
    scratch_bytes = tb * ((3 * Hp + 128) + 5 * H + 2 * Lpad) * 4
    est = weight_bytes + act_bytes + out_bytes + scratch_bytes + (2 << 20)
    vmem_limit = int(max(est, 16 * 1024 * 1024))

    logits_pad, y = pl.pallas_call(
        _head_kernel,
        grid=grid,
        in_specs=[x_spec] + weight_specs,
        out_specs=out_specs,
        out_shape=out_shape,
        compiler_params=pltpu.CompilerParams(
            dimension_semantics=dim_sem,
            vmem_limit_bytes=vmem_limit),
        cost_estimate=cost,
    )(x12, *weights)

    return logits_pad[:, :L], y


def _reference(features, params, num_labels):
    """Pure-JAX reference mirroring the PyTorch module (eval mode)."""
    B, S, H = features.shape
    b = B // 2
    x = features[:, 0, :].reshape(b, 2 * H)
    i1, i2 = x[:, :H], x[:, H:]
    o1 = i1 @ params["w1"] + params["b1"]
    s1 = jnp.sum(o1 * i2, axis=1, keepdims=True)
    o2 = i1 @ params["w2"] + params["b2"]
    s2 = jnp.sum(o2 * i2, axis=1, keepdims=True)
    W_out = jnp.concatenate([s1, s2], axis=1)
    V_out = jnp.concatenate([i1, i2], axis=1) @ params["vw"] + params["vb"]
    ntn = jax.nn.relu(W_out + V_out)
    xc = jnp.concatenate([x, ntn], axis=1)
    h = jnp.tanh(xc @ params["dw"] + params["db"])
    logits = h @ params["ow"] + params["ob"]
    return logits, h


def make_params(key, hidden_size, num_labels):
    ks = jax.random.split(key, 10)
    H, L = hidden_size, num_labels
    s = 0.05
    # Weights stored as [in_features, out_features] (torch Linear weight^T).
    return {
        "w1": s * jax.random.normal(ks[0], (H, H), jnp.float32),
        "b1": s * jax.random.normal(ks[1], (1, H), jnp.float32),
        "w2": s * jax.random.normal(ks[2], (H, H), jnp.float32),
        "b2": s * jax.random.normal(ks[3], (1, H), jnp.float32),
        "vw": s * jax.random.normal(ks[4], (2 * H, 2), jnp.float32),
        "vb": s * jax.random.normal(ks[5], (1, 2), jnp.float32),
        "dw": s * jax.random.normal(ks[6], (2 * H + 2, H), jnp.float32),
        "db": s * jax.random.normal(ks[7], (1, H), jnp.float32),
        "ow": s * jax.random.normal(ks[8], (H, L), jnp.float32),
        "ob": s * jax.random.normal(ks[9], (1, L), jnp.float32),
    }


if __name__ == "__main__":
    key = jax.random.PRNGKey(0)
    k_feat, k_param = jax.random.split(key)

    B, S, H, L = 4, 8, 32, 2          # batch (even), seq, hidden_size, num_labels
    features = jax.random.normal(k_feat, (B, S, H), jnp.float32)
    params = make_params(k_param, H, L)

    ref_logits, ref_y = _reference(features, params, L)

    # --- f32 compute path: exactness check against the reference -------------
    packed_f32 = prepare_params(params, L, compute_dtype=jnp.float32)
    logits, y = roberta_classification_head(features, packed_f32)
    logits = jax.block_until_ready(logits)
    y = jax.block_until_ready(y)
    assert logits.shape == (B // 2, L) and y.shape == (B // 2, H)
    assert jnp.allclose(logits, ref_logits, atol=1e-5, rtol=1e-5)
    assert jnp.allclose(y, ref_y, atol=1e-5, rtol=1e-5)

    # --- bf16 MXU path (production default): loose-tolerance check -----------
    packed_bf16 = prepare_params(params, L)            # bf16 default
    logits16, y16 = roberta_classification_head(features, packed_bf16)
    logits16 = jax.block_until_ready(logits16)
    y16 = jax.block_until_ready(y16)
    assert jnp.allclose(logits16, ref_logits, atol=1e-1, rtol=1e-1)
    assert jnp.allclose(y16, ref_y, atol=1e-1, rtol=1e-1)

    print("KERNEL_OK")
</pallas_src>

<mosaic_0001>
module attributes {stable_mosaic.version = 11 : i64} {
  func.func @_head_kernel(%arg0: i32, %arg1: memref<2x64xf32, #tpu.memory_space<vmem>>, %arg2: memref<32x512xf32, #tpu.memory_space<vmem>>, %arg3: memref<1x32xf32, #tpu.memory_space<vmem>>, %arg4: memref<1x32xf32, #tpu.memory_space<vmem>>, %arg5: memref<1x128xf32, #tpu.memory_space<vmem>>, %arg6: memref<32x32xf32, #tpu.memory_space<vmem>>, %arg7: memref<2x32xf32, #tpu.memory_space<vmem>>, %arg8: memref<1x32xf32, #tpu.memory_space<vmem>>, %arg9: memref<32x128xf32, #tpu.memory_space<vmem>>, %arg10: memref<1x128xf32, #tpu.memory_space<vmem>>, %arg11: memref<2x128xf32, #tpu.memory_space<vmem>>, %arg12: memref<2x32xf32, #tpu.memory_space<vmem>>) attributes {dimension_semantics = [#tpu.dimension_semantics<arbitrary>], iteration_bounds = array<i64: 1>, scalar_prefetch = 0 : i64, scratch_operands = 0 : i64, tpu.core_type = #tpu.core_type<tc>, window_params = [{transform_indices = @transform_0, window_bounds = array<i64: 2, 64>}, {pipeline_mode = #tpu.pipeline_mode<synchronous>, transform_indices = @transform_1, window_bounds = array<i64: 32, 512>}, {pipeline_mode = #tpu.pipeline_mode<synchronous>, transform_indices = @transform_2, window_bounds = array<i64: 1, 32>}, {pipeline_mode = #tpu.pipeline_mode<synchronous>, transform_indices = @transform_3, window_bounds = array<i64: 1, 32>}, {pipeline_mode = #tpu.pipeline_mode<synchronous>, transform_indices = @transform_4, window_bounds = array<i64: 1, 128>}, {pipeline_mode = #tpu.pipeline_mode<synchronous>, transform_indices = @transform_5, window_bounds = array<i64: 32, 32>}, {pipeline_mode = #tpu.pipeline_mode<synchronous>, transform_indices = @transform_6, window_bounds = array<i64: 2, 32>}, {pipeline_mode = #tpu.pipeline_mode<synchronous>, transform_indices = @transform_7, window_bounds = array<i64: 1, 32>}, {pipeline_mode = #tpu.pipeline_mode<synchronous>, transform_indices = @transform_8, window_bounds = array<i64: 32, 128>}, {pipeline_mode = #tpu.pipeline_mode<synchronous>, transform_indices = @transform_9, window_bounds = array<i64: 1, 128>}, {transform_indices = @transform_10, window_bounds = array<i64: 2, 128>}, {transform_indices = @transform_11, window_bounds = array<i64: 2, 32>}]} {
    %c0 = arith.constant 0 : index
    %c0_0 = arith.constant 0 : index
    %0 = vector.load %arg1[%c0, %c0_0] : memref<2x64xf32, #tpu.memory_space<vmem>>, vector<2x64xf32>
    %1 = vector.extract_strided_slice %0 {offsets = [0, 32], sizes = [2, 32], strides = [1, 1]} : vector<2x64xf32> to vector<2x32xf32>
    %2 = vector.extract_strided_slice %0 {offsets = [0, 0], sizes = [2, 32], strides = [1, 1]} : vector<2x64xf32> to vector<2x32xf32>
    %3 = vector.extract_strided_slice %0 {offsets = [0, 32], sizes = [2, 32], strides = [1, 1]} : vector<2x64xf32> to vector<2x32xf32>
    %c0_1 = arith.constant 0 : index
    %c0_2 = arith.constant 0 : index
    %4 = vector.load %arg2[%c0_1, %c0_2] : memref<32x512xf32, #tpu.memory_space<vmem>>, vector<32x512xf32>
    %cst = arith.constant dense<0.000000e+00> : vector<2x512xf32>
    %5 = tpu.matmul %2, %4, %cst {dimension_numbers = #tpu.dot_dimension_numbers<[1], [0], [0], [1], [0, 0, 1, 1], [], []>} : vector<2x32xf32>, vector<32x512xf32>, vector<2x512xf32> -> vector<2x512xf32>
    %6 = vector.extract_strided_slice %5 {offsets = [0, 0], sizes = [2, 32], strides = [1, 1]} : vector<2x512xf32> to vector<2x32xf32>
    %c0_3 = arith.constant 0 : index
    %c0_4 = arith.constant 0 : index
    %7 = vector.load %arg3[%c0_3, %c0_4] : memref<1x32xf32, #tpu.memory_space<vmem>>, vector<1x32xf32>
    %8 = vector.broadcast %7 : vector<1x32xf32> to vector<2x32xf32>
    %9 = arith.addf %6, %8 : vector<2x32xf32>
    %10 = vector.extract_strided_slice %5 {offsets = [0, 128], sizes = [2, 32], strides = [1, 1]} : vector<2x512xf32> to vector<2x32xf32>
    %c0_5 = arith.constant 0 : index
    %c0_6 = arith.constant 0 : index
    %11 = vector.load %arg4[%c0_5, %c0_6] : memref<1x32xf32, #tpu.memory_space<vmem>>, vector<1x32xf32>
    %12 = vector.broadcast %11 : vector<1x32xf32> to vector<2x32xf32>
    %13 = arith.addf %10, %12 : vector<2x32xf32>
    %14 = vector.extract_strided_slice %5 {offsets = [0, 256], sizes = [2, 32], strides = [1, 1]} : vector<2x512xf32> to vector<2x32xf32>
    %15 = arith.mulf %9, %1 : vector<2x32xf32>
    %cst_7 = arith.constant dense<0.000000e+00> : vector<2xf32>
    %16 = vector.multi_reduction <add>, %15, %cst_7 [1] : vector<2x32xf32> to vector<2xf32>
    %17 = vector.shape_cast %16 : vector<2xf32> to vector<2x1xf32>
    %18 = arith.mulf %13, %1 : vector<2x32xf32>
    %cst_8 = arith.constant dense<0.000000e+00> : vector<2xf32>
    %19 = vector.multi_reduction <add>, %18, %cst_8 [1] : vector<2x32xf32> to vector<2xf32>
    %20 = vector.shape_cast %19 : vector<2xf32> to vector<2x1xf32>
    %c0_9 = arith.constant 0 : index
    %c0_10 = arith.constant 0 : index
    %21 = vector.load %arg5[%c0_9, %c0_10] : memref<1x128xf32, #tpu.memory_space<vmem>>, vector<1x128xf32>
    %22 = vector.extract_strided_slice %5 {offsets = [0, 384], sizes = [2, 1], strides = [1, 1]} : vector<2x512xf32> to vector<2x1xf32>
    %23 = arith.addf %17, %22 : vector<2x1xf32>
    %24 = vector.extract_strided_slice %21 {offsets = [0, 0], sizes = [1, 1], strides = [1, 1]} : vector<1x128xf32> to vector<1x1xf32>
    %25 = vector.broadcast %24 : vector<1x1xf32> to vector<2x1xf32>
    %26 = arith.addf %23, %25 : vector<2x1xf32>
    %cst_11 = arith.constant 0.000000e+00 : f32
    %27 = vector.broadcast %cst_11 : f32 to vector<2x1xf32>
    %28 = arith.maximumf %26, %27 : vector<2x1xf32>
    %29 = vector.extract_strided_slice %5 {offsets = [0, 385], sizes = [2, 1], strides = [1, 1]} : vector<2x512xf32> to vector<2x1xf32>
    %30 = arith.addf %20, %29 : vector<2x1xf32>
    %31 = vector.extract_strided_slice %21 {offsets = [0, 1], sizes = [1, 1], strides = [1, 1]} : vector<1x128xf32> to vector<1x1xf32>
    %32 = vector.broadcast %31 : vector<1x1xf32> to vector<2x1xf32>
    %33 = arith.addf %30, %32 : vector<2x1xf32>
    %cst_12 = arith.constant 0.000000e+00 : f32
    %34 = vector.broadcast %cst_12 : f32 to vector<2x1xf32>
    %35 = arith.maximumf %33, %34 : vector<2x1xf32>
    %c0_13 = arith.constant 0 : index
    %c0_14 = arith.constant 0 : index
    %36 = vector.load %arg6[%c0_13, %c0_14] : memref<32x32xf32, #tpu.memory_space<vmem>>, vector<32x32xf32>
    %cst_15 = arith.constant dense<0.000000e+00> : vector<2x32xf32>
    %37 = tpu.matmul %3, %36, %cst_15 {dimension_numbers = #tpu.dot_dimension_numbers<[1], [0], [0], [1], [0, 0, 1, 1], [], []>} : vector<2x32xf32>, vector<32x32xf32>, vector<2x32xf32> -> vector<2x32xf32>
    %38 = arith.addf %14, %37 : vector<2x32xf32>
    %c0_16 = arith.constant 0 : index
    %c0_17 = arith.constant 0 : index
    %39 = vector.load %arg7[%c0_16, %c0_17] : memref<2x32xf32, #tpu.memory_space<vmem>>, vector<1x32xf32>
    %40 = vector.broadcast %28 : vector<2x1xf32> to vector<2x32xf32>
    %41 = vector.broadcast %39 : vector<1x32xf32> to vector<2x32xf32>
    %42 = arith.mulf %40, %41 : vector<2x32xf32>
    %43 = arith.addf %38, %42 : vector<2x32xf32>
    %c1 = arith.constant 1 : index
    %c0_18 = arith.constant 0 : index
    %44 = vector.load %arg7[%c1, %c0_18] : memref<2x32xf32, #tpu.memory_space<vmem>>, vector<1x32xf32>
    %45 = vector.broadcast %35 : vector<2x1xf32> to vector<2x32xf32>
    %46 = vector.broadcast %44 : vector<1x32xf32> to vector<2x32xf32>
    %47 = arith.mulf %45, %46 : vector<2x32xf32>
    %48 = arith.addf %43, %47 : vector<2x32xf32>
    %c0_19 = arith.constant 0 : index
    %c0_20 = arith.constant 0 : index
    %49 = vector.load %arg8[%c0_19, %c0_20] : memref<1x32xf32, #tpu.memory_space<vmem>>, vector<1x32xf32>
    %50 = vector.broadcast %49 : vector<1x32xf32> to vector<2x32xf32>
    %51 = arith.addf %48, %50 : vector<2x32xf32>
    %52 = math.tanh %51 : vector<2x32xf32>
    %c0_21 = arith.constant 0 : index
    %c0_22 = arith.constant 0 : index
    %53 = vector.load %arg12[%c0_21, %c0_22] : memref<2x32xf32, #tpu.memory_space<vmem>>, vector<2x32xf32>
    tpu.vector_store %arg12[%c0_21, %c0_22], %52 {strides = array<i32>} : memref<2x32xf32, #tpu.memory_space<vmem>>, vector<2x32xf32>,
    %c0_23 = arith.constant 0 : index
    %c0_24 = arith.constant 0 : index
    %54 = vector.load %arg9[%c0_23, %c0_24] : memref<32x128xf32, #tpu.memory_space<vmem>>, vector<32x128xf32>
    %cst_25 = arith.constant dense<0.000000e+00> : vector<2x128xf32>
    %55 = tpu.matmul %52, %54, %cst_25 {dimension_numbers = #tpu.dot_dimension_numbers<[1], [0], [0], [1], [0, 0, 1, 1], [], []>} : vector<2x32xf32>, vector<32x128xf32>, vector<2x128xf32> -> vector<2x128xf32>
    %c0_26 = arith.constant 0 : index
    %c0_27 = arith.constant 0 : index
    %56 = vector.load %arg10[%c0_26, %c0_27] : memref<1x128xf32, #tpu.memory_space<vmem>>, vector<1x128xf32>
    %57 = vector.broadcast %56 : vector<1x128xf32> to vector<2x128xf32>
    %58 = arith.addf %55, %57 : vector<2x128xf32>
    %c0_28 = arith.constant 0 : index
    %c0_29 = arith.constant 0 : index
    %59 = vector.load %arg11[%c0_28, %c0_29] : memref<2x128xf32, #tpu.memory_space<vmem>>, vector<2x128xf32>
    tpu.vector_store %arg11[%c0_28, %c0_29], %58 {strides = array<i32>} : memref<2x128xf32, #tpu.memory_space<vmem>>, vector<2x128xf32>,
    return
  }
  func.func @transform_0(%arg0: i32) -> (i32, i32) {
    %c0_i32 = arith.constant 0 : i32
    %c0_i32_0 = arith.constant 0 : i32
    return %arg0, %c0_i32 : i32, i32
  }
  func.func @transform_1(%arg0: i32) -> (i32, i32) {
    %c0_i32 = arith.constant 0 : i32
    %c0_i32_0 = arith.constant 0 : i32
    %c0_i32_1 = arith.constant 0 : i32
    return %c0_i32, %c0_i32_0 : i32, i32
  }
  func.func @transform_2(%arg0: i32) -> (i32, i32) {
    %c0_i32 = arith.constant 0 : i32
    %c0_i32_0 = arith.constant 0 : i32
    %c0_i32_1 = arith.constant 0 : i32
    return %c0_i32, %c0_i32_0 : i32, i32
  }
  func.func @transform_3(%arg0: i32) -> (i32, i32) {
    %c0_i32 = arith.constant 0 : i32
    %c0_i32_0 = arith.constant 0 : i32
    %c0_i32_1 = arith.constant 0 : i32
    return %c0_i32, %c0_i32_0 : i32, i32
  }
  func.func @transform_4(%arg0: i32) -> (i32, i32) {
    %c0_i32 = arith.constant 0 : i32
    %c0_i32_0 = arith.constant 0 : i32
    %c0_i32_1 = arith.constant 0 : i32
    return %c0_i32, %c0_i32_0 : i32, i32
  }
  func.func @transform_5(%arg0: i32) -> (i32, i32) {
    %c0_i32 = arith.constant 0 : i32
    %c0_i32_0 = arith.constant 0 : i32
    %c0_i32_1 = arith.constant 0 : i32
    return %c0_i32, %c0_i32_0 : i32, i32
  }
  func.func @transform_6(%arg0: i32) -> (i32, i32) {
    %c0_i32 = arith.constant 0 : i32
    %c0_i32_0 = arith.constant 0 : i32
    %c0_i32_1 = arith.constant 0 : i32
    return %c0_i32, %c0_i32_0 : i32, i32
  }
  func.func @transform_7(%arg0: i32) -> (i32, i32) {
    %c0_i32 = arith.constant 0 : i32
    %c0_i32_0 = arith.constant 0 : i32
    %c0_i32_1 = arith.constant 0 : i32
    return %c0_i32, %c0_i32_0 : i32, i32
  }
  func.func @transform_8(%arg0: i32) -> (i32, i32) {
    %c0_i32 = arith.constant 0 : i32
    %c0_i32_0 = arith.constant 0 : i32
    %c0_i32_1 = arith.constant 0 : i32
    return %c0_i32, %c0_i32_0 : i32, i32
  }
  func.func @transform_9(%arg0: i32) -> (i32, i32) {
    %c0_i32 = arith.constant 0 : i32
    %c0_i32_0 = arith.constant 0 : i32
    %c0_i32_1 = arith.constant 0 : i32
    return %c0_i32, %c0_i32_0 : i32, i32
  }
  func.func @transform_10(%arg0: i32) -> (i32, i32) {
    %c0_i32 = arith.constant 0 : i32
    %c0_i32_0 = arith.constant 0 : i32
    return %arg0, %c0_i32 : i32, i32
  }
  func.func @transform_11(%arg0: i32) -> (i32, i32) {
    %c0_i32 = arith.constant 0 : i32
    %c0_i32_0 = arith.constant 0 : i32
    return %arg0, %c0_i32 : i32, i32
  }
}

</mosaic_0001>

<bundles_post_ra>
// kernel: tpu_custom_call.1
= control target key start
LH: loop header
LB: loop body
LE: loop exit
PB: predicated region body
PF: predicated region fallthrough
CT: control target
= control target key end

     0   :  { %17 = vsyncpa [#allocation3], 0  ;;  %s933_s0 = inlined_call_operand.hbm [shape: f32[2,64], index: 0, kind: input, shape index: {}]   ;;  %s934_s1 = inlined_call_operand.hbm [shape: f32[32,512], index: 1, kind: input, shape index: {}]   ;;  %s935_s2 = inlined_call_operand.vmem [shape: f32[1,32], index: 2, kind: input, shape index: {}]   ;;  %s936_s3 = inlined_call_operand.vmem [shape: f32[1,32], index: 3, kind: input, shape index: {}]   ;;  %s937_s4 = inlined_call_operand.vmem [shape: f32[1,128], index: 4, kind: input, shape index: {}]   ;;  %s938_s5 = inlined_call_operand.hbm [shape: f32[32,32], index: 5, kind: input, shape index: {}]   ;;  %s939_s6 = inlined_call_operand.vmem [shape: f32[2,32], index: 6, kind: input, shape index: {}]   ;;  %s940_s7 = inlined_call_operand.vmem [shape: f32[1,32], index: 7, kind: input, shape index: {}]   ;;  %s941_s8 = inlined_call_operand.hbm [shape: f32[32,128], index: 8, kind: input, shape index: {}]   ;;  %s942_s9 = inlined_call_operand.vmem [shape: f32[1,128], index: 9, kind: input, shape index: {}]   ;;  %s943_s10 = inlined_call_operand.hbm [shape: f32[2,128], index: 10, kind: output, shape index: {0}]   ;;  %s944_s11 = inlined_call_operand.hbm [shape: f32[2,32], index: 11, kind: output, shape index: {1}]  }
   0x1   :  { %18 = vsyncpa [#allocation6], 0 }
   0x2   :  { %19 = vsyncpa [#allocation9], 0 }
   0x3   :  { %20 = vsyncpa [#allocation4], 0 }
   0x4   :  { %21 = vsyncpa [#allocation12], 0  ;;  %s757_s17 = smov [#allocation5]   ;;  %s615_s21 = scalar_lea.hbm %s934_s1, 2048 }
   0x5   :  { %s37_s18 = sshll.u32 %s757_s17, 4  ;;  %p616_p0 = scmp.ne.s32.totalorder %s934_s1, %s615_s21  ;;  %s38_s18 = int_to_ptr.vmem [resolvable:$true] %s37_s18 }
   0x6   :  { %p619_p1 = scmp.lt.u32.totalorder %s615_s21, %s934_s1 }
   0x8   :  { %p621_p2 = pnand %p619_p1, %p616_p0 }
   0xa   :  { %624 = shalt.err (!%p621_p2)
}
   0xb   :  { %s625_s26 = scalar_lea.vmem %s38_s18, 2048  ;;  %p630_p4 = scmp.lt.s32.totalorder %s38_s18, %s38_s18 }
   0xc   :  { %p626_p3 = scmp.ne.s32.totalorder %s38_s18, %s625_s26  ;;  %p631_p5 = scmp.lt.s32.totalorder %s625_s26, %s625_s26 }
   0xe   :  { %p632_p6 = por %p631_p5, %p630_p4 }
  0x10   :  { %p633_p7 = pnand %p632_p6, %p626_p3 }
  0x12   :  { %636 = shalt.err (!%p633_p7)
}
  0x13   :  { %s758_s27 = smov 512   ;;  %s759_s28 = smov 32  }
  0x14   :  { %43 = dma.hbm_to_vmem [thread:$0]  %s934_s1, 2048, %s38_s18, [#allocation6], %s758_s27, %s758_s27, %s759_s28  }
  0x15   :  { %s760_s12 = smov [#allocation2]   ;;  %s761_s14 = smov [#allocation7]  }
  0x16   :  { %s28_s13 = sshll.u32 %s760_s12, 4  ;;  %s55_s15 = sshll.u32 %s761_s14, 4  ;;  %s29_s13 = int_to_ptr.vmem [resolvable:$true] %s28_s13  ;;  %s56_s15 = int_to_ptr.vmem [resolvable:$true] %s55_s15 }
  0x17   :  { %s637_s19 = scalar_lea.hbm %s933_s0, 32 }
  0x18   :  { %p638_p8 = scmp.ne.s32.totalorder %s933_s0, %s637_s19  ;;  %p641_p9 = scmp.lt.u32.totalorder %s637_s19, %s933_s0 }
  0x1a   :  { %p643_p10 = pnand %p641_p9, %p638_p8 }
  0x1c   :  { %646 = shalt.err (!%p643_p10)
}
  0x1d   :  { %s647_s1 = scalar_lea.vmem %s29_s13, 32  ;;  %p652_p12 = scmp.lt.s32.totalorder %s29_s13, %s29_s13 }
  0x1e   :  { %p648_p11 = scmp.ne.s32.totalorder %s29_s13, %s647_s1  ;;  %p653_p13 = scmp.lt.s32.totalorder %s647_s1, %s647_s1 }
  0x20   :  { %p654_p0 = por %p653_p13, %p652_p12 }
  0x22   :  { %p655_p1 = pnand %p654_p0, %p648_p11 }
  0x24   :  { %658 = shalt.err (!%p655_p1)
}
  0x25   :  { %31 = dma.hbm_to_vmem [thread:$0]  %s933_s0, 32, %s29_s13, [#allocation3]  }
  0x26   :  { %s659_s27 = scalar_lea.hbm %s938_s5, 512 }
  0x27   :  { %p660_p2 = scmp.ne.s32.totalorder %s938_s5, %s659_s27  ;;  %p663_p3 = scmp.lt.u32.totalorder %s659_s27, %s938_s5 }
  0x29   :  { %p665_p4 = pnand %p663_p3, %p660_p2 }
  0x2b   :  { %668 = shalt.err (!%p665_p4)
}
  0x2c   :  { %s669_s14 = scalar_lea.vmem %s56_s15, 512  ;;  %p674_p6 = scmp.lt.s32.totalorder %s56_s15, %s56_s15 }
  0x2d   :  { %p670_p5 = scmp.ne.s32.totalorder %s56_s15, %s669_s14  ;;  %p675_p7 = scmp.lt.s32.totalorder %s669_s14, %s669_s14 }
  0x2f   :  { %p676_p8 = por %p675_p7, %p674_p6 }
  0x31   :  { %p677_p9 = pnand %p676_p8, %p670_p5 }
  0x33   :  { %680 = shalt.err (!%p677_p9)
}
  0x34   :  { %s762_s0 = smov 128   ;;  %s763_s13 = smov 8  }
  0x35   :  { %61 = dma.hbm_to_vmem [thread:$0]  %s938_s5, 512, %s56_s15, [#allocation6], %s762_s0, %s762_s0, %s763_s13  }
  0x36   :  { %s764_s19 = smov [#allocation8]   ;;  %s681_s23 = scalar_lea.hbm %s941_s8, 512 }
  0x37   :  { %s71_s20 = sshll.u32 %s764_s19, 4  ;;  %p682_p10 = scmp.ne.s32.totalorder %s941_s8, %s681_s23  ;;  %s72_s20 = int_to_ptr.vmem [resolvable:$true] %s71_s20 }
  0x38   :  { %p685_p11 = scmp.lt.u32.totalorder %s681_s23, %s941_s8 }
  0x3a   :  { %p687_p12 = pnand %p685_p11, %p682_p10 }
  0x3c   :  { %690 = shalt.err (!%p687_p12)
}
  0x3d   :  { %s691_s26 = scalar_lea.vmem %s72_s20, 512  ;;  %p696_p0 = scmp.lt.s32.totalorder %s72_s20, %s72_s20 }
  0x3e   :  { %p692_p13 = scmp.ne.s32.totalorder %s72_s20, %s691_s26  ;;  %p697_p1 = scmp.lt.s32.totalorder %s691_s26, %s691_s26 }
  0x40   :  { %p698_p2 = por %p697_p1, %p696_p0 }
  0x42   :  { %p699_p3 = pnand %p698_p2, %p692_p13 }
  0x44   :  { %702 = shalt.err (!%p699_p3)
}
  0x45   :  { %77 = dma.hbm_to_vmem [thread:$0]  %s941_s8, 512, %s72_s20, [#allocation9], %s762_s0, %s762_s0, %s763_s13  }
  0x46   :  { %747 = dma.done.wait [#allocation3], 32  }
  0x47   :  { %748 = vsyncadd [#allocation3], 4294967264 }
  0x48   :  { %749 = dma.done.wait [#allocation6], 2560  }
  0x49   :  { %750 = vsyncadd [#allocation6], 4294964736 }
  0x4a   :  { %751 = dma.done.wait [#allocation9], 512  }
  0x4b   :  { %752 = vsyncadd [#allocation9], 4294966784  ;;  %v765_v0 = vmov 0.0   ;;  %v94_v1 = vld [vmem:[#allocation5 + $0x8] sm:$0xff]  ;;  %v93_v3 = vld [vmem:[#allocation5] sm:$0xff]  ;;  %s766_s8 = smov 96  }
  0x4c   :  { %177 = vmatprep.mubr.f32.mxu0 %v765_v0  ;;  %248 = vmatprep.mubr.f32.mxu1 %v765_v0  ;;  %v98_v2 = vld [vmem:[#allocation5 + $0x28] sm:$0xff]  ;;  %v97_v5 = vld [vmem:[#allocation5 + $0x20] sm:$0xff]  ;;  %v92_v12 = vld [vmem:[#allocation2] sm:$0x3]  ;;  %vm109_vm0 = vcmask 261120   ;;  %v767_v29 = vmov 0.0|0.0  }
  0x4d   :  { %v566_v4 = vpack.c.bf16 %v98_v2, %v94_v1  ;;  %v102_v6 = vld [vmem:[#allocation5 + $0x48] sm:$0xff]  ;;  %v568_v8 = vpack.c.bf16 %v97_v5, %v93_v3  ;;  %v101_v10 = vld [vmem:[#allocation5 + $0x40] sm:$0xff]  ;;  %271 = vrot.lane.b32.xlu0 %v92_v12, %s766_s8  ;;  %v96_v13 = vld [vmem:[#allocation5 + $0x18] sm:$0xff]  ;;  %vm768_vm1 = vmmov 0   ;;  %vm275_vm2 = vcmask 254976   ;;  %s771_s17 = smov [#allocation11]  }
  0x4e   :  { %v106_v7 = vld [vmem:[#allocation5 + $0x68] sm:$0xff]  ;;  %v105_v11 = vld [vmem:[#allocation5 + $0x60] sm:$0xff]  ;;  %v100_v14 = vld [vmem:[#allocation5 + $0x38] sm:$0xff]  ;;  %v769_v46 = vmov 0   ;;  %v770_v47 = vmov 1   ;;  %s508_s19 = sshll.u32 %s771_s17, 4  ;;  %s509_s19 = int_to_ptr.vmem [resolvable:$true] %s508_s19 }
  0x4f   :  { %v570_v9 = vpack.c.bf16 %v106_v7, %v102_v6  ;;  %567 = vmatprep.subr.bf16.mxu0 %v566_v4  ;;  %v95_v15 = vld [vmem:[#allocation5 + $0x10] sm:$0xff]  ;;  %v572_v16 = vpack.c.bf16 %v105_v11, %v101_v10  ;;  %v574_v17 = vpack.c.bf16 %v100_v14, %v96_v13  ;;  %v296_v19 = vld [vmem:[#allocation7] sm:$0xff]  ;;  %v297_v20 = vld [vmem:[#allocation7 + $0x8] sm:$0xff]  ;;  %610 = vset.pattern.permute.xlu1 %v769_v46  ;;  %s703_s20 = scalar_lea.vmem %s509_s19, 32  ;;  %p708_p5 = scmp.lt.s32.totalorder %s509_s19, %s509_s19 }
  0x50   :  { %569 = vmatpush1.bf16.msra.mxu0 %v568_v8  ;;  %v99_v18 = vld [vmem:[#allocation5 + $0x30] sm:$0xff]  ;;  %v104_v22 = vld [vmem:[#allocation5 + $0x58] sm:$0xff]  ;;  %v583_v28 = vpack.c.bf16 %v297_v20, %v296_v19  ;;  %612 = vset.pattern.permute.xlu0 %v770_v47  ;;  %v407_v60 = vld [vmem:[#allocation8] sm:$0xff]  ;;  %p704_p4 = scmp.ne.s32.totalorder %s509_s19, %s703_s20  ;;  %p709_p6 = scmp.lt.s32.totalorder %s703_s20, %s703_s20 }
  0x51   :  { %571 = vmatprep.subr.bf16.mxu0 %v570_v9  ;;  %v576_v21 = vpack.c.bf16 %v99_v18, %v95_v15  ;;  %v108_v23 = vld [vmem:[#allocation5 + $0x78] sm:$0xff]  ;;  %v103_v24 = vld [vmem:[#allocation5 + $0x50] sm:$0xff]  ;;  %575 = vmatprep.subr.bf16.mxu1 %v574_v17  ;;  %v408_v61 = vld [vmem:[#allocation8 + $0x8] sm:$0xff] }
  0x52   :  { %v578_v25 = vpack.c.bf16 %v108_v23, %v104_v22  ;;  %v107_v26 = vld [vmem:[#allocation5 + $0x70] sm:$0xff]  ;;  %v299_v31 = vld [vmem:[#allocation7 + $0x18] sm:$0xff]  ;;  %v589_v62 = vpack.c.bf16 %v408_v61, %v407_v60  ;;  %p710_p7 = por %p709_p6, %p708_p5 }
  0x53   :  { %577 = vmatpush1.bf16.msra.mxu1 %v576_v21  ;;  %v580_v27 = vpack.c.bf16 %v107_v26, %v103_v24  ;;  %v298_v30 = vld [vmem:[#allocation7 + $0x10] sm:$0xff]  ;;  %v525_v34 = vld [vmem:[%s935_s2] ss:$0 sm:$0xff]  ;;  %v530_v5 = vld [vmem:[%s939_s6 + $0x1] ss:$0 sm:$0xff] }
  0x54   :  { %573 = vmatpush1.bf16.msra.mxu0 %v572_v16  ;;  %579 = vmatprep.subr.bf16.mxu1 %v578_v25  ;;  %v586_v32 = vpack.c.bf16 %v299_v31, %v298_v30  ;;  %v526_v35 = vld [vmem:[%s936_s3] ss:$0 sm:$0xff]  ;;  %v409_v63 = vld [vmem:[#allocation8 + $0x10] sm:$0xff]  ;;  %p711_p8 = pnand %p710_p7, %p704_p4 }
  0x55   :  { %582 = vmatprep.subr.bf16.mxu0 %v767_v29  ;;  %v527_v51 = vld [vmem:[%s937_s4] ss:$0 sm:$0xff] }
  0x56   :  { %v529_v2 = vld [vmem:[%s939_s6] ss:$0 sm:$0xff] }
  0x57   :  { %523 = vmatmul.mubr.msk.f32.vlgmr.msra.gmra.mrb[0].mxu0 %vm109_vm0, %v92_v12  ;;  %581 = vmatpush1.bf16.msra.mxu1 %v580_v27  ;;  %v531_v9 = vld [vmem:[%s940_s7] ss:$0 sm:$0xff] }
  0x58   :  { %584 = vmatpush3.bf16.msra.mxu0 %v583_v28  ;;  %552 = vmatprep.mubr.msk.f32.mxu0 %vm768_vm1, %v765_v0 }
  0x59   :  { %585 = vmatprep.subr.bf16.mxu0 %v767_v29  ;;  %588 = vmatprep.subr.bf16.mxu1 %v767_v29 }
  0x5a   :  { %524 = vmatmul.mubr.msk.f32.vlgmr.msra.gmra.mrb[0].mxu1 %vm109_vm0, %v92_v12 }
  0x5b   :  { %563 = vmatprep.mubr.msk.f32.mxu1 %vm768_vm1, %v765_v0  ;;  %590 = vmatpush3.bf16.msra.mxu1 %v589_v62  ;;  %v410_v0 = vld [vmem:[#allocation8 + $0x18] sm:$0xff] }
  0x5c   :  { %587 = vmatpush3.bf16.msra.mxu0 %v586_v32  ;;  %591 = vmatprep.subr.bf16.mxu1 %v767_v29  ;;  %v592_v1 = vpack.c.bf16 %v410_v0, %v409_v63 }
  0x5f   :  { %593 = vmatpush3.bf16.msra.mxu1 %v592_v1 }
  0xbf   :  { %v272_v33 = vpop.permute.xlu0 %271 }
  0xc0   :  { %553 = vmatmul.mubr.msk.f32.vlgmr.msra.gmra.mrb[2].mxu0 %vm109_vm0, %v272_v33 }
 0x12a   :  { %v179_v36 = vpop.f32.mrb[0].mxu0 }
 0x12b   :  { %v262_v37 = vadd.f32 %v525_v34, %v179_v36  ;;  %v181_v38 = vpop.f32.mrb[1].mxu0 }
 0x12c   :  { %v270_v39 = vadd.f32 %v526_v35, %v181_v38 }
 0x12d   :  { %v274_v40 = vmul.f32 %v272_v33, %v262_v37  ;;  %v250_v41 = vpop.f32.mrb[0].mxu1 }
 0x12e   :  { %v279_v42 = vmul.f32 %v272_v33, %v270_v39  ;;  %v252_v43 = vpop.f32.mrb[1].mxu1 }
 0x12f   :  { %v276_v44 = vsel %vm275_vm2, %v274_v40, 0.0 }
 0x130   :  { %277 = vadd.xlane.f32.xlu0 %v276_v44  ;;  %v280_v45 = vsel %vm275_vm2, %v279_v42, 0.0 }
 0x131   :  { %281 = vadd.xlane.f32.xlu1 %v280_v45 }
 0x193   :  { %v368_v48 = vpop.f32.mrb[2].mxu0 }
 0x194   :  { %v372_v49 = vadd.f32 %v368_v48, %v250_v41  ;;  %v554_v50 = vpop.f32.mrb[3].mxu0 }
 0x1bd   :  { %v278_v52 = vpop.xlane.xlu0 %277 }
 0x1be   :  { %v284_v53 = vadd.f32 %v278_v52, %v252_v43  ;;  %v282_v54 = vpop.xlane.xlu1 %281 }
 0x1bf   :  { %v293_v55 = vadd.f32 %v282_v54, %v252_v43 }
 0x1c0   :  { %v291_v56 = vadd.f32 %v527_v51, %v284_v53 }
 0x1c1   :  { %v294_v58 = vadd.f32 %v527_v51, %v293_v55 }
 0x1c2   :  { %v292_v57 = vmax.f32 %v291_v56, 0.0 }
 0x1c3   :  { %v295_v59 = vmax.f32 %v294_v58, 0.0 }
 0x1c4   :  { %376 = vperm.xlu1 %610, %v292_v57  }
 0x1c8   :  { %611 = vset.pattern.permute.xlu1 %v770_v47 }
 0x1c9   :  { %388 = vperm.xlu1 %611, %v295_v59  }
 0x243   :  { %v377_v3 = vpop.permute.xlu1 %376 }
 0x244   :  { %v383_v4 = vmul.f32 %v529_v2, %v377_v3 }
 0x246   :  { %v384_v7 = vadd.f32 %v383_v4, %v372_v49 }
 0x248   :  { %v389_v6 = vpop.permute.xlu1 %388 }
 0x249   :  { %v395_v8 = vmul.f32 %v530_v5, %v389_v6 }
 0x24b   :  { %v396_v10 = vadd.f32 %v395_v8, %v384_v7 }
 0x24d   :  { %v404_v11 = vadd.f32 %v531_v9, %v396_v10 }
 0x24f   :  { %613 = vtanh.f32 %v404_v11 }
 0x259   :  { %v614_v12 = vpop.eup %613 }
 0x25a   :  { %406 = vst.msk [vmem:[#allocation11] sm:$0x3] %vm275_vm2, %v614_v12  ;;  %564 = vmatmul.mubr.msk.f32.vlgmr.msra.gmra.mrb[2].mxu1 %vm109_vm0, %v614_v12 }
 0x25b   :  { %714 = shalt.err (!%p711_p8)
}
 0x25c   :  { %s715_s21 = scalar_lea.hbm %s944_s11, 32 }
 0x25d   :  { %p716_p9 = scmp.ne.s32.totalorder %s944_s11, %s715_s21  ;;  %p719_p10 = scmp.lt.u32.totalorder %s715_s21, %s944_s11 }
 0x25f   :  { %p721_p11 = pnand %p719_p10, %p716_p9 }
 0x261   :  { %724 = shalt.err (!%p721_p11)
}
 0x262   :  { %511 = dma.vmem_to_hbm [thread:$0]  %s509_s19, 32, %s944_s11, [#allocation12]   ;;  %v532_v13 = vld [vmem:[%s942_s9] ss:$0 sm:$0xff] }
 0x263   :  { %s772_s15 = smov [#allocation10]  }
 0x264   :  { %s498_s8 = sshll.u32 %s772_s15, 4  ;;  %s499_s8 = int_to_ptr.vmem [resolvable:$true] %s498_s8 }
 0x265   :  { %s725_s27 = scalar_lea.vmem %s499_s8, 32  ;;  %p730_p13 = scmp.lt.s32.totalorder %s499_s8, %s499_s8 }
 0x266   :  { %p726_p12 = scmp.ne.s32.totalorder %s499_s8, %s725_s27  ;;  %p731_p0 = scmp.lt.s32.totalorder %s725_s27, %s725_s27 }
 0x268   :  { %p732_p1 = por %p731_p0, %p730_p13 }
 0x26a   :  { %p733_p2 = pnand %p732_p1, %p726_p12 }
 0x32d   :  { %v487_v14 = vpop.f32.mrb[2].mxu1 }
 0x32e   :  { %v488_v15 = vadd.f32 %v532_v13, %v487_v14  ;;  %v565_v16 = vpop.f32.mrb[3].mxu1 }
 0x330   :  { %491 = vst [vmem:[#allocation10] sm:$0x3] %v488_v15 }
 0x331   :  { %736 = shalt.err (!%p733_p2)
}
 0x332   :  { %s737_s29 = scalar_lea.hbm %s943_s10, 32 }
 0x333   :  { %p738_p3 = scmp.ne.s32.totalorder %s943_s10, %s737_s29  ;;  %p741_p4 = scmp.lt.u32.totalorder %s737_s29, %s943_s10 }
 0x335   :  { %p743_p5 = pnand %p741_p4, %p738_p3 }
 0x337   :  { %746 = shalt.err (!%p743_p5)
}
 0x338   :  { %501 = dma.vmem_to_hbm [thread:$0]  %s499_s8, 32, %s943_s10, [#allocation4]  }
 0x339   :  { %753 = dma.done.wait [#allocation4], 32  }
 0x33a   :  { %754 = vsyncadd [#allocation4], 4294967264 }
 0x33b   :  { %755 = dma.done.wait [#allocation12], 32  }
 0x33c   :  { %756 = vsyncadd [#allocation12], 4294967264 }
 0x33d   :  { %518 = vsyncpa [#allocation3], 1 }
 0x33e   :  { %519 = vsyncpa [#allocation6], 1 }
 0x33f   :  { %520 = vsyncpa [#allocation9], 1 }
 0x340   :  { %521 = vsyncpa [#allocation4], 1 }
 0x341   :  { %522 = vsyncpa [#allocation12], 1 }

</bundles_post_ra>
